<compile_context>
chip_gen: v6e
topology: v6e:2x2x1
jax: 0.10.0
libtpu: 0.0.40
codegen_flags: <defaults>
</compile_context>

<pallas_src>
import jax
import jax.numpy as jnp
from jax.experimental import pallas as pl
from jax.experimental.pallas import tpu as pltpu


def _round_up(x, m):
    return (x + m - 1) // m * m


def _make_decoder_kernel(n_layers, hidden_dim, batch_pad):
    """Build a kernel closed over the (static) layer count / sizes."""
    H = hidden_dim
    B = batch_pad

    def kernel(*refs):
        # inputs : ids (SMEM), emb (V,1,E), h_in, c_in,
        #          (w_cat_t, bias) * n_layers, wfc_t, bfc
        # outputs: pred, h_out, c_out
        # scratch: x0 (B, E)
        ids_ref, emb_ref, h_in_ref, c_in_ref = refs[0], refs[1], refs[2], refs[3]
        layer_refs = refs[4:4 + 2 * n_layers]
        wfc_ref = refs[4 + 2 * n_layers]
        bfc_ref = refs[5 + 2 * n_layers]
        pred_ref = refs[6 + 2 * n_layers]
        h_out_ref = refs[7 + 2 * n_layers]
        c_out_ref = refs[8 + 2 * n_layers]
        x0_ref = refs[9 + 2 * n_layers]

        # In-kernel embedding gather (dropout is identity at inference).
        for b in range(B):
            x0_ref[pl.ds(b, 1), :] = emb_ref[ids_ref[b]]          # (1, E) row
        x = x0_ref[...]                                            # (B, E)

        for l in range(n_layers):
            w_cat = layer_refs[2 * l][...]                         # (in_dim+H, 4H)
            bias = layer_refs[2 * l + 1][...]                      # (1, 4H)
            h_prev = h_in_ref[l]                                   # (B, H)
            c_prev = c_in_ref[l]                                   # (B, H)

            # Single fused MXU push: gates = [x | h_prev] @ [W_ih^T ; W_hh^T] + b
            xh = jnp.concatenate([x, h_prev], axis=1)              # (B, in_dim+H)
            gates = jnp.dot(xh, w_cat,
                            preferred_element_type=jnp.float32) + bias

            # Two full-vreg EUP passes, then cheap H-lane extracts.
            sig = jax.nn.sigmoid(gates)                            # (B, 4H)
            tnh = jnp.tanh(gates)                                  # (B, 4H)
            i_g = sig[:, 0 * H:1 * H]
            f_g = sig[:, 1 * H:2 * H]
            g_g = tnh[:, 2 * H:3 * H]
            o_g = sig[:, 3 * H:4 * H]

            c = f_g * c_prev + i_g * g_g
            h = o_g * jnp.tanh(c)

            h_out_ref[l] = h
            c_out_ref[l] = c
            x = h                                                  # feeds next layer

        # fc_out projection — lane-dense (vocab padded to a multiple of 128).
        pred_ref[...] = (jnp.dot(x, wfc_ref[...],
                                 preferred_element_type=jnp.float32)
                         + bfc_ref[...])

    return kernel


@jax.jit
def decoder_forward(prepared, input_tokens, hidden, cell):
    """input_tokens: (B,) int32; hidden/cell: (n_layers, B, H).

    Mirrors Decoder.forward: unsqueeze(0) + embedding + dropout + LSTM single
    step + fc_out. Returns (prediction, hidden, cell).
    """
    n_layers, B, H = hidden.shape
    V, _, E = prepared["emb3"].shape
    output_dim = V
    vocab_pad = prepared["fc_w_t"].shape[1]
    B_pad = _round_up(max(B, 8), 8)                 # fill the 8-sublane dim

    ids_pad = jnp.zeros((B_pad,), jnp.int32).at[:B].set(
        input_tokens.astype(jnp.int32))
    h_pad = jnp.pad(hidden.astype(jnp.float32), ((0, 0), (0, B_pad - B), (0, 0)))
    c_pad = jnp.pad(cell.astype(jnp.float32), ((0, 0), (0, B_pad - B), (0, 0)))

    flat_weights = []
    for layer in prepared["layers"]:
        flat_weights.extend([layer["w_cat_t"], layer["bias"]])

    vmem_spec = pl.BlockSpec(memory_space=pltpu.MemorySpace.VMEM)
    smem_spec = pl.BlockSpec(memory_space=pltpu.MemorySpace.SMEM)
    n_inputs = 4 + len(flat_weights) + 2

    kernel = _make_decoder_kernel(n_layers, H, B_pad)
    # Single grid-less call: all operands are tiny full-array VMEM blocks.
    # (For a multi-step decode loop one would add a step grid axis whose
    #  weight index_maps ignore the step + input_output_aliases for state.)
    pred_p, h_n_p, c_n_p = pl.pallas_call(
        kernel,
        out_shape=(
            jax.ShapeDtypeStruct((B_pad, vocab_pad), jnp.float32),
            jax.ShapeDtypeStruct((n_layers, B_pad, H), jnp.float32),
            jax.ShapeDtypeStruct((n_layers, B_pad, H), jnp.float32),
        ),
        in_specs=[smem_spec] + [vmem_spec] * (n_inputs - 1),
        out_specs=(vmem_spec, vmem_spec, vmem_spec),
        scratch_shapes=[pltpu.VMEM((B_pad, E), jnp.float32)],
    )(ids_pad, prepared["emb3"], h_pad, c_pad, *flat_weights,
      prepared["fc_w_t"], prepared["fc_b"])

    # Slice away batch / vocab padding.
    pred = pred_p[:B, :output_dim]
    h_n = h_n_p[:, :B, :]
    c_n = c_n_p[:, :B, :]
    return pred, h_n, c_n


def init_decoder_params(key, output_dim, emb_dim, hidden_dim, n_layers):
    """Deterministic parameter init mirroring the PyTorch module's shapes."""
    keys = jax.random.split(key, 3 + 4 * n_layers)
    k = 1.0 / jnp.sqrt(hidden_dim)
    params = {
        "embedding": jax.random.normal(keys[0], (output_dim, emb_dim), jnp.float32),
        "fc_w": jax.random.uniform(keys[1], (output_dim, hidden_dim), jnp.float32, -k, k),
        "fc_b": jax.random.uniform(keys[2], (output_dim,), jnp.float32, -k, k),
    }
    layers = []
    for l in range(n_layers):
        in_dim = emb_dim if l == 0 else hidden_dim
        k0, k1, k2, k3 = keys[3 + 4 * l: 3 + 4 * (l + 1)]
        layers.append({
            "w_ih": jax.random.uniform(k0, (4 * hidden_dim, in_dim), jnp.float32, -k, k),
            "w_hh": jax.random.uniform(k1, (4 * hidden_dim, hidden_dim), jnp.float32, -k, k),
            "b_ih": jax.random.uniform(k2, (4 * hidden_dim,), jnp.float32, -k, k),
            "b_hh": jax.random.uniform(k3, (4 * hidden_dim,), jnp.float32, -k, k),
        })
    params["layers"] = layers
    return params


def prepare_decoder_params(params):
    """One-time re-layout:
       * embedding reshaped to (V, 1, E) for leading-axis dynamic row gather,
       * per-layer W_ih^T / W_hh^T fused into one (in_dim+H, 4H) matrix,
       * fused biases b_ih + b_hh,
       * fc weight/bias transposed and zero-padded to a 128-multiple vocab."""
    V, E = params["embedding"].shape
    H = params["fc_w"].shape[1]
    vocab_pad = _round_up(V, 128)

    fc_w_t = jnp.zeros((H, vocab_pad), jnp.float32)
    fc_w_t = fc_w_t.at[:, :V].set(jnp.asarray(params["fc_w"], jnp.float32).T)
    fc_b = jnp.zeros((1, vocab_pad), jnp.float32)
    fc_b = fc_b.at[0, :V].set(jnp.asarray(params["fc_b"], jnp.float32))

    prepared = {
        "emb3": jnp.asarray(params["embedding"], jnp.float32).reshape(V, 1, E),
        "fc_w_t": fc_w_t,                                     # (H, vocab_pad)
        "fc_b": fc_b,                                         # (1, vocab_pad)
        "layers": [],
    }
    for layer in params["layers"]:
        w_cat_t = jnp.concatenate(
            [jnp.asarray(layer["w_ih"], jnp.float32).T,       # (in_dim, 4H)
             jnp.asarray(layer["w_hh"], jnp.float32).T],      # (H, 4H)
            axis=0)                                           # (in_dim+H, 4H)
        bias = jnp.asarray(layer["b_ih"] + layer["b_hh"],
                           jnp.float32).reshape(1, -1)        # (1, 4H)
        prepared["layers"].append({"w_cat_t": w_cat_t, "bias": bias})
    return prepared


def _reference_forward(params, input_tokens, hidden, cell):
    """Pure-JAX reference mirroring PyTorch Decoder.forward (inference mode)."""
    x = jnp.take(params["embedding"], input_tokens, axis=0).astype(jnp.float32)
    h_list, c_list = [], []
    for l, layer in enumerate(params["layers"]):
        H = layer["w_hh"].shape[1]
        gates = (x @ layer["w_ih"].T + hidden[l] @ layer["w_hh"].T
                 + layer["b_ih"] + layer["b_hh"])
        i = jax.nn.sigmoid(gates[:, 0 * H:1 * H])
        f = jax.nn.sigmoid(gates[:, 1 * H:2 * H])
        g = jnp.tanh(gates[:, 2 * H:3 * H])
        o = jax.nn.sigmoid(gates[:, 3 * H:4 * H])
        c = f * cell[l] + i * g
        h = o * jnp.tanh(c)
        h_list.append(h)
        c_list.append(c)
        x = h
    pred = x @ params["fc_w"].T + params["fc_b"]
    return pred, jnp.stack(h_list, 0), jnp.stack(c_list, 0)


if __name__ == "__main__":
    # Small shapes consistent with the module: vocab=50, emb=32, hidden=32, 2 layers.
    OUTPUT_DIM, EMB_DIM, HIDDEN_DIM, N_LAYERS = 50, 32, 32, 2
    B = 2

    key = jax.random.PRNGKey(0)
    pkey, tkey, hkey, ckey = jax.random.split(key, 4)
    params = init_decoder_params(pkey, OUTPUT_DIM, EMB_DIM, HIDDEN_DIM, N_LAYERS)
    prepared = prepare_decoder_params(params)

    input_tokens = jax.random.randint(tkey, (B,), 0, OUTPUT_DIM, dtype=jnp.int32)
    hidden = jax.random.normal(hkey, (N_LAYERS, B, HIDDEN_DIM), jnp.float32)
    cell = jax.random.normal(ckey, (N_LAYERS, B, HIDDEN_DIM), jnp.float32)

    pred, h_n, c_n = decoder_forward(prepared, input_tokens, hidden, cell)
    jax.block_until_ready((pred, h_n, c_n))

    # Sanity check against pure-JAX reference.
    p_ref, h_ref, c_ref = _reference_forward(params, input_tokens, hidden, cell)
    assert pred.shape == (B, OUTPUT_DIM)
    assert h_n.shape == (N_LAYERS, B, HIDDEN_DIM)
    assert c_n.shape == (N_LAYERS, B, HIDDEN_DIM)
    assert jnp.allclose(pred, p_ref, atol=1e-4, rtol=1e-4)
    assert jnp.allclose(h_n, h_ref, atol=1e-4, rtol=1e-4)
    assert jnp.allclose(c_n, c_ref, atol=1e-4, rtol=1e-4)

    print("KERNEL_OK")
</pallas_src>

<mosaic_0001>
module attributes {stable_mosaic.version = 11 : i64} {
  func.func @kernel(%arg0: memref<8xi32, #tpu.memory_space<smem>>, %arg1: memref<50x1x32xf32, #tpu.memory_space<vmem>>, %arg2: memref<2x8x32xf32, #tpu.memory_space<vmem>>, %arg3: memref<2x8x32xf32, #tpu.memory_space<vmem>>, %arg4: memref<64x128xf32, #tpu.memory_space<vmem>>, %arg5: memref<1x128xf32, #tpu.memory_space<vmem>>, %arg6: memref<64x128xf32, #tpu.memory_space<vmem>>, %arg7: memref<1x128xf32, #tpu.memory_space<vmem>>, %arg8: memref<32x128xf32, #tpu.memory_space<vmem>>, %arg9: memref<1x128xf32, #tpu.memory_space<vmem>>, %arg10: memref<8x128xf32, #tpu.memory_space<vmem>>, %arg11: memref<2x8x32xf32, #tpu.memory_space<vmem>>, %arg12: memref<2x8x32xf32, #tpu.memory_space<vmem>>, %arg13: memref<8x32xf32, #tpu.memory_space<vmem>>) attributes {dimension_semantics = [], scalar_prefetch = 0 : i64, scratch_operands = 1 : i64, tpu.core_type = #tpu.core_type<tc>} {
    %c0 = arith.constant 0 : index
    %0 = memref.load %arg0[%c0] : memref<8xi32, #tpu.memory_space<smem>>
    %1 = arith.index_cast %0 : i32 to index
    %c0_0 = arith.constant 0 : index
    %c0_1 = arith.constant 0 : index
    %2 = vector.load %arg1[%1, %c0_0, %c0_1] : memref<50x1x32xf32, #tpu.memory_space<vmem>>, vector<1x1x32xf32>
    %3 = vector.shape_cast %2 : vector<1x1x32xf32> to vector<1x32xf32>
    %c0_2 = arith.constant 0 : index
    %c0_3 = arith.constant 0 : index
    %4 = vector.load %arg13[%c0_2, %c0_3] : memref<8x32xf32, #tpu.memory_space<vmem>>, vector<1x32xf32>
    tpu.vector_store %arg13[%c0_2, %c0_3], %3 {strides = array<i32>} : memref<8x32xf32, #tpu.memory_space<vmem>>, vector<1x32xf32>,
    %c1 = arith.constant 1 : index
    %5 = memref.load %arg0[%c1] : memref<8xi32, #tpu.memory_space<smem>>
    %6 = arith.index_cast %5 : i32 to index
    %c0_4 = arith.constant 0 : index
    %c0_5 = arith.constant 0 : index
    %7 = vector.load %arg1[%6, %c0_4, %c0_5] : memref<50x1x32xf32, #tpu.memory_space<vmem>>, vector<1x1x32xf32>
    %8 = vector.shape_cast %7 : vector<1x1x32xf32> to vector<1x32xf32>
    %c1_6 = arith.constant 1 : index
    %c0_7 = arith.constant 0 : index
    %9 = vector.load %arg13[%c1_6, %c0_7] : memref<8x32xf32, #tpu.memory_space<vmem>>, vector<1x32xf32>
    tpu.vector_store %arg13[%c1_6, %c0_7], %8 {strides = array<i32>} : memref<8x32xf32, #tpu.memory_space<vmem>>, vector<1x32xf32>,
    %c2 = arith.constant 2 : index
    %10 = memref.load %arg0[%c2] : memref<8xi32, #tpu.memory_space<smem>>
    %11 = arith.index_cast %10 : i32 to index
    %c0_8 = arith.constant 0 : index
    %c0_9 = arith.constant 0 : index
    %12 = vector.load %arg1[%11, %c0_8, %c0_9] : memref<50x1x32xf32, #tpu.memory_space<vmem>>, vector<1x1x32xf32>
    %13 = vector.shape_cast %12 : vector<1x1x32xf32> to vector<1x32xf32>
    %c2_10 = arith.constant 2 : index
    %c0_11 = arith.constant 0 : index
    %14 = vector.load %arg13[%c2_10, %c0_11] : memref<8x32xf32, #tpu.memory_space<vmem>>, vector<1x32xf32>
    tpu.vector_store %arg13[%c2_10, %c0_11], %13 {strides = array<i32>} : memref<8x32xf32, #tpu.memory_space<vmem>>, vector<1x32xf32>,
    %c3 = arith.constant 3 : index
    %15 = memref.load %arg0[%c3] : memref<8xi32, #tpu.memory_space<smem>>
    %16 = arith.index_cast %15 : i32 to index
    %c0_12 = arith.constant 0 : index
    %c0_13 = arith.constant 0 : index
    %17 = vector.load %arg1[%16, %c0_12, %c0_13] : memref<50x1x32xf32, #tpu.memory_space<vmem>>, vector<1x1x32xf32>
    %18 = vector.shape_cast %17 : vector<1x1x32xf32> to vector<1x32xf32>
    %c3_14 = arith.constant 3 : index
    %c0_15 = arith.constant 0 : index
    %19 = vector.load %arg13[%c3_14, %c0_15] : memref<8x32xf32, #tpu.memory_space<vmem>>, vector<1x32xf32>
    tpu.vector_store %arg13[%c3_14, %c0_15], %18 {strides = array<i32>} : memref<8x32xf32, #tpu.memory_space<vmem>>, vector<1x32xf32>,
    %c4 = arith.constant 4 : index
    %20 = memref.load %arg0[%c4] : memref<8xi32, #tpu.memory_space<smem>>
    %21 = arith.index_cast %20 : i32 to index
    %c0_16 = arith.constant 0 : index
    %c0_17 = arith.constant 0 : index
    %22 = vector.load %arg1[%21, %c0_16, %c0_17] : memref<50x1x32xf32, #tpu.memory_space<vmem>>, vector<1x1x32xf32>
    %23 = vector.shape_cast %22 : vector<1x1x32xf32> to vector<1x32xf32>
    %c4_18 = arith.constant 4 : index
    %c0_19 = arith.constant 0 : index
    %24 = vector.load %arg13[%c4_18, %c0_19] : memref<8x32xf32, #tpu.memory_space<vmem>>, vector<1x32xf32>
    tpu.vector_store %arg13[%c4_18, %c0_19], %23 {strides = array<i32>} : memref<8x32xf32, #tpu.memory_space<vmem>>, vector<1x32xf32>,
    %c5 = arith.constant 5 : index
    %25 = memref.load %arg0[%c5] : memref<8xi32, #tpu.memory_space<smem>>
    %26 = arith.index_cast %25 : i32 to index
    %c0_20 = arith.constant 0 : index
    %c0_21 = arith.constant 0 : index
    %27 = vector.load %arg1[%26, %c0_20, %c0_21] : memref<50x1x32xf32, #tpu.memory_space<vmem>>, vector<1x1x32xf32>
    %28 = vector.shape_cast %27 : vector<1x1x32xf32> to vector<1x32xf32>
    %c5_22 = arith.constant 5 : index
    %c0_23 = arith.constant 0 : index
    %29 = vector.load %arg13[%c5_22, %c0_23] : memref<8x32xf32, #tpu.memory_space<vmem>>, vector<1x32xf32>
    tpu.vector_store %arg13[%c5_22, %c0_23], %28 {strides = array<i32>} : memref<8x32xf32, #tpu.memory_space<vmem>>, vector<1x32xf32>,
    %c6 = arith.constant 6 : index
    %30 = memref.load %arg0[%c6] : memref<8xi32, #tpu.memory_space<smem>>
    %31 = arith.index_cast %30 : i32 to index
    %c0_24 = arith.constant 0 : index
    %c0_25 = arith.constant 0 : index
    %32 = vector.load %arg1[%31, %c0_24, %c0_25] : memref<50x1x32xf32, #tpu.memory_space<vmem>>, vector<1x1x32xf32>
    %33 = vector.shape_cast %32 : vector<1x1x32xf32> to vector<1x32xf32>
    %c6_26 = arith.constant 6 : index
    %c0_27 = arith.constant 0 : index
    %34 = vector.load %arg13[%c6_26, %c0_27] : memref<8x32xf32, #tpu.memory_space<vmem>>, vector<1x32xf32>
    tpu.vector_store %arg13[%c6_26, %c0_27], %33 {strides = array<i32>} : memref<8x32xf32, #tpu.memory_space<vmem>>, vector<1x32xf32>,
    %c7 = arith.constant 7 : index
    %35 = memref.load %arg0[%c7] : memref<8xi32, #tpu.memory_space<smem>>
    %36 = arith.index_cast %35 : i32 to index
    %c0_28 = arith.constant 0 : index
    %c0_29 = arith.constant 0 : index
    %37 = vector.load %arg1[%36, %c0_28, %c0_29] : memref<50x1x32xf32, #tpu.memory_space<vmem>>, vector<1x1x32xf32>
    %38 = vector.shape_cast %37 : vector<1x1x32xf32> to vector<1x32xf32>
    %c7_30 = arith.constant 7 : index
    %c0_31 = arith.constant 0 : index
    %39 = vector.load %arg13[%c7_30, %c0_31] : memref<8x32xf32, #tpu.memory_space<vmem>>, vector<1x32xf32>
    tpu.vector_store %arg13[%c7_30, %c0_31], %38 {strides = array<i32>} : memref<8x32xf32, #tpu.memory_space<vmem>>, vector<1x32xf32>,
    %c0_32 = arith.constant 0 : index
    %c0_33 = arith.constant 0 : index
    %40 = vector.load %arg13[%c0_32, %c0_33] : memref<8x32xf32, #tpu.memory_space<vmem>>, vector<8x32xf32>
    %c0_34 = arith.constant 0 : index
    %c0_35 = arith.constant 0 : index
    %41 = vector.load %arg4[%c0_34, %c0_35] : memref<64x128xf32, #tpu.memory_space<vmem>>, vector<64x128xf32>
    %c0_36 = arith.constant 0 : index
    %c0_37 = arith.constant 0 : index
    %42 = vector.load %arg5[%c0_36, %c0_37] : memref<1x128xf32, #tpu.memory_space<vmem>>, vector<1x128xf32>
    %c0_38 = arith.constant 0 : index
    %c0_39 = arith.constant 0 : index
    %c0_40 = arith.constant 0 : index
    %43 = vector.load %arg2[%c0_38, %c0_39, %c0_40] : memref<2x8x32xf32, #tpu.memory_space<vmem>>, vector<1x8x32xf32>
    %44 = vector.shape_cast %43 : vector<1x8x32xf32> to vector<8x32xf32>
    %c0_41 = arith.constant 0 : index
    %c0_42 = arith.constant 0 : index
    %c0_43 = arith.constant 0 : index
    %45 = vector.load %arg3[%c0_41, %c0_42, %c0_43] : memref<2x8x32xf32, #tpu.memory_space<vmem>>, vector<1x8x32xf32>
    %46 = vector.shape_cast %45 : vector<1x8x32xf32> to vector<8x32xf32>
    %47 = tpu.concatenate %40, %44 in 1 : vector<8x32xf32>, vector<8x32xf32> -> vector<8x64xf32>
    %cst = arith.constant dense<0.000000e+00> : vector<8x128xf32>
    %48 = tpu.matmul %47, %41, %cst {dimension_numbers = #tpu.dot_dimension_numbers<[1], [0], [0], [1], [0, 0, 1, 1], [], []>} : vector<8x64xf32>, vector<64x128xf32>, vector<8x128xf32> -> vector<8x128xf32>
    %49 = vector.broadcast %42 : vector<1x128xf32> to vector<8x128xf32>
    %50 = arith.addf %48, %49 : vector<8x128xf32>
    %51 = arith.negf %50 : vector<8x128xf32>
    %52 = math.exp %51 : vector<8x128xf32>
    %cst_44 = arith.constant 1.000000e+00 : f32
    %53 = vector.broadcast %cst_44 : f32 to vector<8x128xf32>
    %54 = arith.addf %53, %52 : vector<8x128xf32>
    %55 = arith.divf %53, %54 : vector<8x128xf32>
    %56 = math.tanh %50 : vector<8x128xf32>
    %57 = vector.extract_strided_slice %55 {offsets = [0, 0], sizes = [8, 32], strides = [1, 1]} : vector<8x128xf32> to vector<8x32xf32>
    %58 = vector.extract_strided_slice %55 {offsets = [0, 32], sizes = [8, 32], strides = [1, 1]} : vector<8x128xf32> to vector<8x32xf32>
    %59 = vector.extract_strided_slice %56 {offsets = [0, 64], sizes = [8, 32], strides = [1, 1]} : vector<8x128xf32> to vector<8x32xf32>
    %60 = vector.extract_strided_slice %55 {offsets = [0, 96], sizes = [8, 32], strides = [1, 1]} : vector<8x128xf32> to vector<8x32xf32>
    %61 = arith.mulf %58, %46 : vector<8x32xf32>
    %62 = arith.mulf %57, %59 : vector<8x32xf32>
    %63 = arith.addf %61, %62 : vector<8x32xf32>
    %64 = math.tanh %63 : vector<8x32xf32>
    %65 = arith.mulf %60, %64 : vector<8x32xf32>
    %c0_45 = arith.constant 0 : index
    %c0_46 = arith.constant 0 : index
    %c0_47 = arith.constant 0 : index
    %66 = vector.load %arg11[%c0_45, %c0_46, %c0_47] : memref<2x8x32xf32, #tpu.memory_space<vmem>>, vector<1x8x32xf32>
    %67 = vector.shape_cast %66 : vector<1x8x32xf32> to vector<8x32xf32>
    %68 = vector.shape_cast %65 : vector<8x32xf32> to vector<1x8x32xf32>
    tpu.vector_store %arg11[%c0_45, %c0_46, %c0_47], %68 {strides = array<i32>} : memref<2x8x32xf32, #tpu.memory_space<vmem>>, vector<1x8x32xf32>,
    %c0_48 = arith.constant 0 : index
    %c0_49 = arith.constant 0 : index
    %c0_50 = arith.constant 0 : index
    %69 = vector.load %arg12[%c0_48, %c0_49, %c0_50] : memref<2x8x32xf32, #tpu.memory_space<vmem>>, vector<1x8x32xf32>
    %70 = vector.shape_cast %69 : vector<1x8x32xf32> to vector<8x32xf32>
    %71 = vector.shape_cast %63 : vector<8x32xf32> to vector<1x8x32xf32>
    tpu.vector_store %arg12[%c0_48, %c0_49, %c0_50], %71 {strides = array<i32>} : memref<2x8x32xf32, #tpu.memory_space<vmem>>, vector<1x8x32xf32>,
    %c0_51 = arith.constant 0 : index
    %c0_52 = arith.constant 0 : index
    %72 = vector.load %arg6[%c0_51, %c0_52] : memref<64x128xf32, #tpu.memory_space<vmem>>, vector<64x128xf32>
    %c0_53 = arith.constant 0 : index
    %c0_54 = arith.constant 0 : index
    %73 = vector.load %arg7[%c0_53, %c0_54] : memref<1x128xf32, #tpu.memory_space<vmem>>, vector<1x128xf32>
    %c1_55 = arith.constant 1 : index
    %c0_56 = arith.constant 0 : index
    %c0_57 = arith.constant 0 : index
    %74 = vector.load %arg2[%c1_55, %c0_56, %c0_57] : memref<2x8x32xf32, #tpu.memory_space<vmem>>, vector<1x8x32xf32>
    %75 = vector.shape_cast %74 : vector<1x8x32xf32> to vector<8x32xf32>
    %c1_58 = arith.constant 1 : index
    %c0_59 = arith.constant 0 : index
    %c0_60 = arith.constant 0 : index
    %76 = vector.load %arg3[%c1_58, %c0_59, %c0_60] : memref<2x8x32xf32, #tpu.memory_space<vmem>>, vector<1x8x32xf32>
    %77 = vector.shape_cast %76 : vector<1x8x32xf32> to vector<8x32xf32>
    %78 = tpu.concatenate %65, %75 in 1 : vector<8x32xf32>, vector<8x32xf32> -> vector<8x64xf32>
    %cst_61 = arith.constant dense<0.000000e+00> : vector<8x128xf32>
    %79 = tpu.matmul %78, %72, %cst_61 {dimension_numbers = #tpu.dot_dimension_numbers<[1], [0], [0], [1], [0, 0, 1, 1], [], []>} : vector<8x64xf32>, vector<64x128xf32>, vector<8x128xf32> -> vector<8x128xf32>
    %80 = vector.broadcast %73 : vector<1x128xf32> to vector<8x128xf32>
    %81 = arith.addf %79, %80 : vector<8x128xf32>
    %82 = arith.negf %81 : vector<8x128xf32>
    %83 = math.exp %82 : vector<8x128xf32>
    %cst_62 = arith.constant 1.000000e+00 : f32
    %84 = vector.broadcast %cst_62 : f32 to vector<8x128xf32>
    %85 = arith.addf %84, %83 : vector<8x128xf32>
    %86 = arith.divf %84, %85 : vector<8x128xf32>
    %87 = math.tanh %81 : vector<8x128xf32>
    %88 = vector.extract_strided_slice %86 {offsets = [0, 0], sizes = [8, 32], strides = [1, 1]} : vector<8x128xf32> to vector<8x32xf32>
    %89 = vector.extract_strided_slice %86 {offsets = [0, 32], sizes = [8, 32], strides = [1, 1]} : vector<8x128xf32> to vector<8x32xf32>
    %90 = vector.extract_strided_slice %87 {offsets = [0, 64], sizes = [8, 32], strides = [1, 1]} : vector<8x128xf32> to vector<8x32xf32>
    %91 = vector.extract_strided_slice %86 {offsets = [0, 96], sizes = [8, 32], strides = [1, 1]} : vector<8x128xf32> to vector<8x32xf32>
    %92 = arith.mulf %89, %77 : vector<8x32xf32>
    %93 = arith.mulf %88, %90 : vector<8x32xf32>
    %94 = arith.addf %92, %93 : vector<8x32xf32>
    %95 = math.tanh %94 : vector<8x32xf32>
    %96 = arith.mulf %91, %95 : vector<8x32xf32>
    %c1_63 = arith.constant 1 : index
    %c0_64 = arith.constant 0 : index
    %c0_65 = arith.constant 0 : index
    %97 = vector.load %arg11[%c1_63, %c0_64, %c0_65] : memref<2x8x32xf32, #tpu.memory_space<vmem>>, vector<1x8x32xf32>
    %98 = vector.shape_cast %97 : vector<1x8x32xf32> to vector<8x32xf32>
    %99 = vector.shape_cast %96 : vector<8x32xf32> to vector<1x8x32xf32>
    tpu.vector_store %arg11[%c1_63, %c0_64, %c0_65], %99 {strides = array<i32>} : memref<2x8x32xf32, #tpu.memory_space<vmem>>, vector<1x8x32xf32>,
    %c1_66 = arith.constant 1 : index
    %c0_67 = arith.constant 0 : index
    %c0_68 = arith.constant 0 : index
    %100 = vector.load %arg12[%c1_66, %c0_67, %c0_68] : memref<2x8x32xf32, #tpu.memory_space<vmem>>, vector<1x8x32xf32>
    %101 = vector.shape_cast %100 : vector<1x8x32xf32> to vector<8x32xf32>
    %102 = vector.shape_cast %94 : vector<8x32xf32> to vector<1x8x32xf32>
    tpu.vector_store %arg12[%c1_66, %c0_67, %c0_68], %102 {strides = array<i32>} : memref<2x8x32xf32, #tpu.memory_space<vmem>>, vector<1x8x32xf32>,
    %c0_69 = arith.constant 0 : index
    %c0_70 = arith.constant 0 : index
    %103 = vector.load %arg8[%c0_69, %c0_70] : memref<32x128xf32, #tpu.memory_space<vmem>>, vector<32x128xf32>
    %cst_71 = arith.constant dense<0.000000e+00> : vector<8x128xf32>
    %104 = tpu.matmul %96, %103, %cst_71 {dimension_numbers = #tpu.dot_dimension_numbers<[1], [0], [0], [1], [0, 0, 1, 1], [], []>} : vector<8x32xf32>, vector<32x128xf32>, vector<8x128xf32> -> vector<8x128xf32>
    %c0_72 = arith.constant 0 : index
    %c0_73 = arith.constant 0 : index
    %105 = vector.load %arg9[%c0_72, %c0_73] : memref<1x128xf32, #tpu.memory_space<vmem>>, vector<1x128xf32>
    %106 = vector.broadcast %105 : vector<1x128xf32> to vector<8x128xf32>
    %107 = arith.addf %104, %106 : vector<8x128xf32>
    %c0_74 = arith.constant 0 : index
    %c0_75 = arith.constant 0 : index
    %108 = vector.load %arg10[%c0_74, %c0_75] : memref<8x128xf32, #tpu.memory_space<vmem>>, vector<8x128xf32>
    tpu.vector_store %arg10[%c0_74, %c0_75], %107 {strides = array<i32>} : memref<8x128xf32, #tpu.memory_space<vmem>>, vector<8x128xf32>,
    return
  }
}

</mosaic_0001>

<bundles_post_ra>
// kernel: decoder_forward.1
= control target key start
LH: loop header
LB: loop body
LE: loop exit
PB: predicated region body
PF: predicated region fallthrough
CT: control target
= control target key end

     0   :  { %18 = vsyncpa [#allocation5], 0  ;;  %s1004_s0 = inlined_call_operand.vmem [shape: s32[8], index: 0, kind: input, shape index: {}]   ;;  %s1005_s1 = inlined_call_operand.vmem [shape: f32[50,1,32], index: 1, kind: input, shape index: {}]   ;;  %s1006_s2 = inlined_call_operand.vmem [shape: f32[2,8,32], index: 2, kind: input, shape index: {}]   ;;  %s1007_s3 = inlined_call_operand.vmem [shape: f32[2,8,32], index: 3, kind: input, shape index: {}]   ;;  %s1008_s4 = inlined_call_operand.vmem [shape: f32[64,128], index: 4, kind: input, shape index: {}]   ;;  %s1009_s5 = inlined_call_operand.hbm [shape: f32[1,128], index: 5, kind: input, shape index: {}]   ;;  %s1010_s6 = inlined_call_operand.vmem [shape: f32[64,128], index: 6, kind: input, shape index: {}]   ;;  %s1011_s7 = inlined_call_operand.hbm [shape: f32[1,128], index: 7, kind: input, shape index: {}]   ;;  %s1012_s8 = inlined_call_operand.hbm [shape: f32[32,128], index: 8, kind: input, shape index: {}]   ;;  %s1013_s9 = inlined_call_operand.hbm [shape: f32[1,128], index: 9, kind: input, shape index: {}]   ;;  %s1014_s10 = inlined_call_operand.vmem [shape: f32[8,128], index: 10, kind: output, shape index: {0}]   ;;  %s1015_s11 = inlined_call_operand.vmem [shape: f32[2,8,32], index: 11, kind: output, shape index: {1}]   ;;  %s1016_s12 = inlined_call_operand.vmem [shape: f32[2,8,32], index: 12, kind: output, shape index: {2}]  }
   0x1   :  { %19 = vsyncpa [#allocation4], 0 }
   0x2   :  { %20 = vsyncpa [#allocation8], 0  ;;  %s28_s23 = sshll.u32 %s1004_s0, 4  ;;  %s29_s23 = int_to_ptr.vmem [resolvable:$true] %s28_s23 }
   0x3   :  { %21 = vsyncpa [#allocation11], 0  ;;  %s733_s24 = smov [#allocation7]  }
   0x4   :  { %s58_s25 = sshll.u32 %s733_s24, 4  ;;  %s59_s25 = int_to_ptr.vmem [resolvable:$true] %s58_s25 }
   0x5   :  { %s641_s26 = scalar_lea.vmem %s59_s25, 16  ;;  %s645_s27 = scalar_lea.vmem %s59_s25, 32 }
   0x6   :  { %p642_p0 = scmp.ne.s32.totalorder %s59_s25, %s641_s26  ;;  %p646_p1 = scmp.lt.s32.totalorder %s59_s25, %s59_s25 }
   0x7   :  { %p647_p2 = scmp.lt.s32.totalorder %s645_s27, %s641_s26 }
   0x9   :  { %p648_p3 = por %p647_p2, %p646_p1 }
   0xb   :  { %p649_p4 = pnand %p648_p3, %p642_p0 }
   0xd   :  { %652 = shalt.err (!%p649_p4)
}
   0xe   :  { %61 = dma.hbm_to_vmem [thread:$0]  %s1011_s7, 16, %s59_s25, [#allocation8]  }
   0xf   :  { %s653_s30 = scalar_lea.vmem %s29_s23, 16  ;;  %p658_p6 = scmp.lt.s32.totalorder %s29_s23, %s29_s23 }
  0x10   :  { %p654_p5 = scmp.ne.s32.totalorder %s29_s23, %s653_s30  ;;  %p659_p7 = scmp.lt.s32.totalorder %s653_s30, %s653_s30 }
  0x12   :  { %p660_p8 = por %p659_p7, %p658_p6 }
  0x14   :  { %p661_p9 = pnand %p660_p8, %p654_p5 }
  0x16   :  { %664 = shalt.err (!%p661_p9)
}
  0x17   :  { %s734_s0 = smov [#allocation3]   ;;  %s735_s13 = smov [#allocation6]  }
  0x18   :  { %31 = dma.vmem_to_smem %s29_s23, 16, %s734_s0, [#allocation5]  }
  0x19   :  { %s46_s14 = sshll.u32 %s735_s13, 4  ;;  %s736_s15 = smov [#allocation9]   ;;  %s47_s14 = int_to_ptr.vmem [resolvable:$true] %s46_s14 }
  0x1a   :  { %s67_s16 = sshll.u32 %s736_s15, 4  ;;  %s673_s17 = scalar_lea.vmem %s47_s14, 16  ;;  %s68_s16 = int_to_ptr.vmem [resolvable:$true] %s67_s16 }
  0x1b   :  { %p674_p10 = scmp.ne.s32.totalorder %s47_s14, %s673_s17  ;;  %s677_s18 = scalar_lea.vmem %s47_s14, 32 }
  0x1c   :  { %p678_p11 = scmp.lt.s32.totalorder %s47_s14, %s47_s14  ;;  %p679_p12 = scmp.lt.s32.totalorder %s677_s18, %s673_s17 }
  0x1e   :  { %p680_p13 = por %p679_p12, %p678_p11 }
  0x20   :  { %p681_p0 = pnand %p680_p13, %p674_p10 }
  0x22   :  { %684 = shalt.err (!%p681_p0)
}
  0x23   :  { %49 = dma.hbm_to_vmem [thread:$0]  %s1009_s5, 16, %s47_s14, [#allocation4]  }
  0x24   :  { %s693_s20 = scalar_lea.vmem %s68_s16, 512  ;;  %p698_p2 = scmp.lt.s32.totalorder %s68_s16, %s68_s16 }
  0x25   :  { %p694_p1 = scmp.ne.s32.totalorder %s68_s16, %s693_s20  ;;  %p699_p3 = scmp.lt.s32.totalorder %s693_s20, %s693_s20 }
  0x27   :  { %p700_p4 = por %p699_p3, %p698_p2 }
  0x29   :  { %p701_p5 = pnand %p700_p4, %p694_p1 }
  0x2b   :  { %704 = shalt.err (!%p701_p5)
}
  0x2c   :  { %s737_s21 = smov 128   ;;  %s738_s22 = smov 8  }
  0x2d   :  { %73 = dma.hbm_to_vmem [thread:$0]  %s1012_s8, 512, %s68_s16, [#allocation8], %s737_s21, %s737_s21, %s738_s22  }
  0x2e   :  { %s739_s25 = smov [#allocation10]  }
  0x2f   :  { %s80_s26 = sshll.u32 %s739_s25, 4  ;;  %s81_s26 = int_to_ptr.vmem [resolvable:$true] %s80_s26 }
  0x30   :  { %s713_s27 = scalar_lea.vmem %s81_s26, 16  ;;  %s717_s28 = scalar_lea.vmem %s81_s26, 32 }
  0x31   :  { %p714_p6 = scmp.ne.s32.totalorder %s81_s26, %s713_s27  ;;  %p718_p7 = scmp.lt.s32.totalorder %s81_s26, %s81_s26 }
  0x32   :  { %p719_p8 = scmp.lt.s32.totalorder %s717_s28, %s713_s27 }
  0x34   :  { %p720_p9 = por %p719_p8, %p718_p7 }
  0x36   :  { %p721_p10 = pnand %p720_p9, %p714_p6 }
  0x38   :  { %724 = shalt.err (!%p721_p10)
}
  0x39   :  { %83 = dma.hbm_to_vmem [thread:$0]  %s1013_s9, 16, %s81_s26, [#allocation11]  }
  0x3a   :  { %725 = dma.done.wait [#allocation5], 16  }
  0x3b   :  { %726 = vsyncadd [#allocation5], 4294967280 }
  0x3c   :  { %727 = dma.done.wait [#allocation4], 16  }
  0x3d   :  { %728 = vsyncadd [#allocation4], 4294967280 }
  0x3e   :  { %729 = dma.done.wait [#allocation8], 528  }
  0x3f   :  { %730 = vsyncadd [#allocation8], 4294966768 }
  0x40   :  { %731 = dma.done.wait [#allocation11], 16  }
  0x41   :  { %732 = vsyncadd [#allocation11], 4294967280 }
  0x42   :  { %99 = sfence }
  0x43   :  { %v143_v0 = vld [vmem:[%s1006_s2] sm:$0xff]  ;;  %v141_v1 = vld [vmem:[%s1008_s4 + $0x38] sm:$0xff]  ;;  %s740_s14 = smov 32   ;;  %v741_v2 = vmov 0.0   ;;  %v140_v3 = vld [vmem:[%s1008_s4 + $0x30] sm:$0xff]  ;;  %s100_s16 = sld [smem:[#allocation3]] }
  0x44   :  { %146 = vrot.lane.b32.xlu0 %v143_v0, %s740_s14  ;;  %556 = vmatprep.subr.mxu0 %v741_v2  ;;  %s836_s17 = sld [smem:[#allocation3 + $0x1]]  ;;  %v139_v4 = vld [vmem:[%s1008_s4 + $0x28] sm:$0xff]  ;;  %vm742_vm0 = vmmov 0   ;;  %v144_v5 = vld [vmem:[%s1007_s3] sm:$0xff]  ;;  %vm103_vm1 = vcmask 253952   ;;  %v137_v7 = vld [vmem:[%s1008_s4 + $0x18] sm:$0xff] }
  0x45   :  { %557 = vmatpush3.msra.mxu0 %v141_v1  ;;  %575 = vmatprep.subr.mxu1 %v741_v2  ;;  %s843_s19 = sld [smem:[#allocation3 + $0x2]]  ;;  %v138_v6 = vld [vmem:[%s1008_s4 + $0x20] sm:$0xff]  ;;  %v136_v9 = vld [vmem:[%s1008_s4 + $0x10] sm:$0xff]  ;;  %v135_v12 = vld [vmem:[%s1008_s4 + $0x8] sm:$0xff]  ;;  %vm149_vm2 = vcmask 261120   ;;  %vm157_vm3 = vcmask 523264  }
  0x46   :  { %558 = vmatprep.subr.mxu0 %v741_v2  ;;  %572 = vmatprep.mubr.msk.f32.mxu0 %vm742_vm0, %v741_v2  ;;  %s850_s22 = sld [smem:[#allocation3 + $0x3]]  ;;  %v134_v16 = vld [vmem:[%s1008_s4] sm:$0xff]  ;;  %v521_v22 = vld [vmem:[#allocation6] ss:$0 sm:$0xff]  ;;  %v276_v37 = vld [vmem:[%s1010_s6 + $0x38] sm:$0xff] }
  0x47   :  { %559 = vmatpush3.msra.mxu0 %v140_v3  ;;  %239 = vrot.lane.b32.xlu1 %v144_v5, %s740_s14  ;;  %s857_s25 = sld [smem:[#allocation3 + $0x4]]  ;;  %v275_v38 = vld [vmem:[%s1010_s6 + $0x30] sm:$0xff]  ;;  %v274_v39 = vld [vmem:[%s1010_s6 + $0x28] sm:$0xff]  ;;  %v273_v40 = vld [vmem:[%s1010_s6 + $0x20] sm:$0xff] }
  0x48   :  { %560 = vmatprep.subr.mxu0 %v741_v2  ;;  %591 = vmatprep.mubr.msk.f32.mxu1 %vm742_vm0, %v741_v2  ;;  %s861_s26 = sld [smem:[#allocation3 + $0x5]]  ;;  %v272_v41 = vld [vmem:[%s1010_s6 + $0x18] sm:$0xff]  ;;  %v271_v42 = vld [vmem:[%s1010_s6 + $0x10] sm:$0xff]  ;;  %v270_v44 = vld [vmem:[%s1010_s6 + $0x8] sm:$0xff] }
  0x49   :  { %561 = vmatpush3.msra.mxu0 %v139_v4  ;;  %s101_s8 = scalar_lea.vmem %s1005_s1, %s100_s16  ;;  %s870_s30 = sld [smem:[#allocation3 + $0x6]]  ;;  %576 = vmatpush3.msra.mxu1 %v276_v37  ;;  %v524_v45 = vld [vmem:[%s1006_s2 + $0x8] sm:$0xff]  ;;  %v269_v46 = vld [vmem:[%s1010_s6] sm:$0xff] }
  0x4a   :  { %562 = vmatprep.subr.mxu0 %v741_v2  ;;  %v102_v8 = vld [vmem:[%s101_s8] sm:$0x1]  ;;  %s106_s9 = scalar_lea.vmem %s1005_s1, %s836_s17  ;;  %s876_s15 = sld [smem:[#allocation3 + $0x7]]  ;;  %577 = vmatprep.subr.mxu1 %v741_v2  ;;  %v525_v47 = vld [vmem:[%s1007_s3 + $0x8] sm:$0xff] }
  0x4b   :  { %563 = vmatpush3.msra.mxu0 %v138_v6  ;;  %104 = vst.msk [vmem:[#allocation2] sm:$0x1] %vm103_vm1, %v102_v8  ;;  %v107_v10 = vld [vmem:[%s106_s9] sm:$0x1]  ;;  %s110_s21 = scalar_lea.vmem %s1005_s1, %s843_s19  ;;  %578 = vmatpush3.msra.mxu1 %v275_v38  ;;  %v526_v53 = vld [vmem:[#allocation7] ss:$0 sm:$0xff] }
  0x4c   :  { %564 = vmatprep.subr.mxu0 %v741_v2  ;;  %108 = vst.msk [vmem:[#allocation2 + $0x1] sm:$0x1] %vm103_vm1, %v107_v10  ;;  %v111_v11 = vld [vmem:[%s110_s21] sm:$0x1]  ;;  %s114_s24 = scalar_lea.vmem %s1005_s1, %s850_s22  ;;  %579 = vmatprep.subr.mxu1 %v741_v2  ;;  %v409_v5 = vld [vmem:[#allocation9 + $0x18] sm:$0xff]  ;;  %v406_v8 = vld [vmem:[#allocation9] sm:$0xff] }
  0x4d   :  { %565 = vmatpush3.msra.mxu0 %v137_v7  ;;  %112 = vst.msk [vmem:[#allocation2 + $0x2] sm:$0x1] %vm103_vm1, %v111_v11  ;;  %v115_v13 = vld [vmem:[%s114_s24] sm:$0x1]  ;;  %s118_s29 = scalar_lea.vmem %s1005_s1, %s857_s25  ;;  %580 = vmatpush3.msra.mxu1 %v274_v39  ;;  %v407_v7 = vld [vmem:[#allocation9 + $0x8] sm:$0xff]  ;;  %s744_s3 = smov 96  }
  0x4e   :  { %566 = vmatprep.subr.mxu0 %v741_v2  ;;  %116 = vst.msk [vmem:[#allocation2 + $0x3] sm:$0x1] %vm103_vm1, %v115_v13  ;;  %v119_v14 = vld [vmem:[%s118_s29] sm:$0x1]  ;;  %s122_s0 = scalar_lea.vmem %s1005_s1, %s861_s26  ;;  %581 = vmatprep.subr.mxu1 %v741_v2 }
  0x4f   :  { %567 = vmatpush3.msra.mxu0 %v136_v9  ;;  %120 = vst.msk [vmem:[#allocation2 + $0x4] sm:$0x1] %vm103_vm1, %v119_v14  ;;  %v123_v15 = vld [vmem:[%s122_s0] sm:$0x1]  ;;  %s126_s18 = scalar_lea.vmem %s1005_s1, %s870_s30  ;;  %582 = vmatpush3.msra.mxu1 %v273_v40  ;;  %v531_v14 = vld [vmem:[#allocation10] ss:$0 sm:$0xff] }
  0x50   :  { %568 = vmatprep.subr.mxu0 %v741_v2  ;;  %124 = vst.msk [vmem:[#allocation2 + $0x5] sm:$0x1] %vm103_vm1, %v123_v15  ;;  %v127_v17 = vld [vmem:[%s126_s18] sm:$0x1]  ;;  %s130_s26 = scalar_lea.vmem %s1005_s1, %s876_s15  ;;  %s743_s1 = smov 64   ;;  %583 = vmatprep.subr.mxu1 %v741_v2 }
  0x51   :  { %569 = vmatpush3.msra.mxu0 %v135_v12  ;;  %128 = vst.msk [vmem:[#allocation2 + $0x6] sm:$0x1] %vm103_vm1, %v127_v17  ;;  %v131_v18 = vld [vmem:[%s130_s26] sm:$0x1]  ;;  %584 = vmatpush3.msra.mxu1 %v272_v41 }
  0x52   :  { %570 = vmatprep.subr.mxu0 %v741_v2  ;;  %132 = vst.msk [vmem:[#allocation2 + $0x7] sm:$0x1] %vm103_vm1, %v131_v18  ;;  %585 = vmatprep.subr.mxu1 %v741_v2  ;;  %v408_v6 = vld [vmem:[#allocation9 + $0x10] sm:$0xff] }
  0x53   :  { %571 = vmatpush3.msra.mxu0 %v134_v16  ;;  %586 = vmatpush3.msra.mxu1 %v271_v42 }
  0x54   :  { %594 = vmatprep.subr.mxu0 %v741_v2  ;;  %587 = vmatprep.subr.mxu1 %v741_v2 }
  0x55   :  { %588 = vmatpush3.msra.mxu1 %v270_v44 }
  0x56   :  { %589 = vmatprep.subr.mxu1 %v741_v2 }
  0x57   :  { %590 = vmatpush3.msra.mxu1 %v269_v46 }
  0x59   :  { %v133_v19 = vld [vmem:[#allocation2] sm:$0xff] }
  0xb6   :  { %v147_v20 = vpop.permute.xlu0 %146 }
  0xb7   :  { %v150_v21 = vsel %vm149_vm2, %v133_v19, %v147_v20 }
  0xb8   :  { %573 = vmatmul.mubr.msk.f32.vlgmr.msra.gmra.mxu0 %vm157_vm3, %v150_v21 }
  0xb9   :  { %602 = vmatprep.mubr.msk.f32.mxu0 %vm742_vm0, %v741_v2  ;;  %v240_v33 = vpop.permute.xlu1 %239  ;;  %595 = vmatpush3.msra.mxu0 %v409_v5 }
  0xba   :  { %596 = vmatprep.subr.mxu0 %v741_v2 }
  0xbb   :  { %597 = vmatpush3.msra.mxu0 %v408_v6 }
  0xbc   :  { %598 = vmatprep.subr.mxu0 %v741_v2 }
  0xbd   :  { %599 = vmatpush3.msra.mxu0 %v407_v7 }
  0xbe   :  { %600 = vmatprep.subr.mxu0 %v741_v2 }
  0xbf   :  { %601 = vmatpush3.msra.mxu0 %v406_v8 }
 0x178   :  { %v227_v23 = vpop.f32.mrf.mxu0 }
 0x179   :  { %v228_v24 = vadd.f32 %v521_v22, %v227_v23 }
 0x17a   :  { %v574_v25 = vpop.f32.mrf.mxu0 }
 0x17b   :  { %617 = vtanh.f32 %v228_v24  ;;  %v523_v27 = vmul.f32 -1.442695, %v228_v24 }
 0x17d   :  { %619 = vpow2.f32 %v523_v27 }
 0x188   :  { %v618_v26 = vpop.eup %617 }
 0x189   :  { %244 = vrot.lane.b32.xlu0 %v618_v26, %s743_s1 }
 0x18a   :  { %v620_v28 = vpop.eup %619 }
 0x18b   :  { %v234_v29 = vadd.f32 1.0, %v620_v28 }
 0x18d   :  { %621 = vrcp.f32 %v234_v29 }
 0x19a   :  { %v622_v30 = vpop.eup %621 }
 0x19b   :  { %v242_v34 = vmul.f32 %v622_v30, %v240_v33 }
 0x1fb   :  { %v245_v31 = vpop.permute.xlu0 %244 }
 0x1fc   :  { %v247_v32 = vmul.f32 %v622_v30, %v245_v31 }
 0x1fe   :  { %249 = vrot.lane.b32.xlu1 %v247_v32, %s740_s14 }
 0x270   :  { %v250_v35 = vpop.permute.xlu1 %249 }
 0x271   :  { %v930_v36 = vadd.f32 %v250_v35, %v242_v34 }
 0x273   :  { %623 = vtanh.f32 %v930_v36 }
 0x280   :  { %v624_v43 = vpop.eup %623 }
 0x281   :  { %255 = vrot.lane.b32.xlu0 %v624_v43, %s743_s1 }
 0x285   :  { %283 = vrot.lane.b32.xlu0 %v524_v45, %s740_s14 }
 0x289   :  { %374 = vrot.lane.b32.xlu0 %v525_v47, %s740_s14 }
 0x2f3   :  { %v256_v48 = vpop.permute.xlu0 %255 }
 0x2f4   :  { %v258_v49 = vmul.f32 %v622_v30, %v256_v48 }
 0x2f6   :  { %260 = vrot.lane.b32.xlu1 %v258_v49, %s740_s14 }
 0x2f7   :  { %v284_v50 = vpop.permute.xlu0 %283 }
 0x2fb   :  { %v375_v0 = vpop.permute.xlu0 %374 }
 0x368   :  { %v261_v51 = vpop.permute.xlu1 %260 }
 0x369   :  { %263 = vst.msk [vmem:[%s1015_s11] sm:$0xff] %vm149_vm2, %v261_v51  ;;  %v286_v52 = vsel %vm149_vm2, %v261_v51, %v284_v50 }
 0x36a   :  { %592 = vmatmul.mubr.msk.f32.vlgmr.msra.gmra.mxu1 %vm157_vm3, %v286_v52 }
 0x42a   :  { %v362_v54 = vpop.f32.mrf.mxu1 }
 0x42b   :  { %v363_v55 = vadd.f32 %v526_v53, %v362_v54 }
 0x42c   :  { %v593_v56 = vpop.f32.mrf.mxu1 }
 0x42d   :  { %625 = vtanh.f32 %v363_v55  ;;  %v528_v58 = vmul.f32 -1.442695, %v363_v55 }
 0x42f   :  { %627 = vpow2.f32 %v528_v58 }
 0x43a   :  { %v626_v57 = vpop.eup %625 }
 0x43b   :  { %379 = vrot.lane.b32.xlu1 %v626_v57, %s743_s1 }
 0x43c   :  { %v628_v59 = vpop.eup %627 }
 0x43d   :  { %v369_v60 = vadd.f32 1.0, %v628_v59 }
 0x43f   :  { %629 = vrcp.f32 %v369_v60 }
 0x44c   :  { %v630_v61 = vpop.eup %629 }
 0x44d   :  { %v377_v1 = vmul.f32 %v630_v61, %v375_v0 }
 0x4ad   :  { %v380_v62 = vpop.permute.xlu1 %379 }
 0x4ae   :  { %v382_v63 = vmul.f32 %v630_v61, %v380_v62 }
 0x4b0   :  { %384 = vrot.lane.b32.xlu1 %v382_v63, %s740_s14 }
 0x522   :  { %v385_v3 = vpop.permute.xlu1 %384 }
 0x523   :  { %v387_v4 = vadd.f32 %v385_v3, %v377_v1 }
 0x525   :  { %631 = vtanh.f32 %v387_v4 }
 0x532   :  { %v632_v9 = vpop.eup %631 }
 0x533   :  { %390 = vrot.lane.b32.xlu0 %v632_v9, %s743_s1 }
 0x537   :  { %265 = vrot.lane.b32.xlu0 %v930_v36, %s744_s3 }
 0x5a5   :  { %v391_v10 = vpop.permute.xlu0 %390 }
 0x5a6   :  { %v393_v11 = vmul.f32 %v630_v61, %v391_v10 }
 0x5a8   :  { %395 = vrot.lane.b32.xlu1 %v393_v11, %s740_s14 }
 0x5a9   :  { %v266_v12 = vpop.permute.xlu0 %265 }
 0x5aa   :  { %268 = vst.msk [vmem:[%s1016_s12] sm:$0xff] %vm149_vm2, %v266_v12 }
 0x5ac   :  { %401 = vrot.lane.b32.xlu1 %v387_v4, %s744_s3 }
 0x61a   :  { %v396_v13 = vpop.permute.xlu1 %395 }
 0x61b   :  { %529 = vst.msk [vmem:[%s1015_s11 + $0x8] sm:$0xff] %vm149_vm2, %v396_v13  ;;  %603 = vmatmul.mubr.msk.f32.vlgmr.msra.gmra.mxu0 %vm149_vm2, %v396_v13 }
 0x61e   :  { %v402_v2 = vpop.permute.xlu1 %401 }
 0x61f   :  { %530 = vst.msk [vmem:[%s1016_s12 + $0x8] sm:$0xff] %vm149_vm2, %v402_v2 }
 0x6db   :  { %v485_v15 = vpop.f32.mrf.mxu0 }
 0x6dc   :  { %v486_v16 = vadd.f32 %v531_v14, %v485_v15 }
 0x6dd   :  { %v604_v17 = vpop.f32.mrf.mxu0 }
 0x6de   :  { %489 = vst [vmem:[%s1014_s10] sm:$0xff] %v486_v16 }
 0x6df   :  { %502 = vsyncpa [#allocation4], 1 }
 0x6e0   :  { %503 = vsyncpa [#allocation8], 1 }
 0x6e1   :  { %504 = vsyncpa [#allocation11], 1 }
 0x6e2   :  { %505 = vsyncpa [#allocation5], 1 }

</bundles_post_ra>
